<compile_context>
chip_gen: v5e
topology: v5e:2x2
jax: 0.10.0
libtpu: 0.0.40
codegen_flags: <defaults>
</compile_context>

<pallas_src>
import functools

import jax
import jax.numpy as jnp
from jax.experimental import pallas as pl
from jax.experimental.pallas import tpu as pltpu

_MASK_VAL = -2e30   # fill for masked (non-edge) scores
_M_INIT = -1e30     # online-softmax running-max init; > _MASK_VAL so that
                    # exp(_MASK_VAL - m) underflows to exactly 0 even before
                    # any real edge has been seen for a row.


def _round_up(x, m):
    return (x + m - 1) // m * m


# ---------------------------------------------------------------------------
# Kernels
# ---------------------------------------------------------------------------

def gat_transform_kernel(x_ref, w_ref, feat_ref, e_ref, *, hc, apply_input_elu):
    """[feat | E] = (ELU?)(x) @ [W | W@A] -- one bf16 MXU matmul per row tile."""
    x = x_ref[...].astype(jnp.float32)
    if apply_input_elu:
        # F.elu (alpha=1.0) between conv1 and conv2, fused into conv2's transform.
        x = jnp.where(x > 0, x, jnp.exp(x) - 1.0)
    fe = jnp.dot(x.astype(jnp.bfloat16), w_ref[...],
                 preferred_element_type=jnp.float32)          # [TM, hc + 2H]
    feat_ref[...] = fe[:, :hc].astype(feat_ref.dtype)         # bf16 features
    e_ref[...] = fe[:, hc:]                                   # f32 attention logits


def gat_attn_kernel(nnz_ref, esrc_ref, edst_ref, bias_ref, adj_ref, feat_ref,
                    out_ref, m_ref, l_ref, acc_ref, *,
                    heads, out_per_head, num_col_tiles, negative_slope=0.2):
    """Online-softmax attention + aggregation for one (row tile, col tile)."""
    i = pl.program_id(0)
    k = pl.program_id(1)
    C = out_per_head

    @pl.when(k == 0)
    def _init():
        m_ref[...] = jnp.full_like(m_ref, _M_INIT)
        l_ref[...] = jnp.zeros_like(l_ref)
        acc_ref[...] = jnp.zeros_like(acc_ref)

    @pl.when(nnz_ref[i * num_col_tiles + k] > 0)      # block-sparse skip
    def _update():
        mask = adj_ref[...].astype(jnp.float32) > 0                   # [TM, TN]
        m_old = m_ref[...]                                            # [TM, H]
        l_old = l_ref[...]
        new_m, new_l, new_acc = [], [], []
        for h in range(heads):                                        # static unroll
            # scores[i, j] = <h_i, a_dst> + <h_j, a_src>  (precomputed in E)
            scores = edst_ref[:, h:h + 1] + esrc_ref[h:h + 1, :]      # [TM, TN]
            scores = jnp.where(scores > 0, scores, negative_slope * scores)
            masked = jnp.where(mask, scores, _MASK_VAL)
            m_h_old = m_old[:, h:h + 1]
            m_h = jnp.maximum(m_h_old, jnp.max(masked, axis=-1, keepdims=True))
            alpha = jnp.exp(m_h_old - m_h)                            # rescale old
            p = jnp.exp(masked - m_h)          # masked entries underflow to 0
            new_l.append(alpha * l_old[:, h:h + 1]
                         + jnp.sum(p, axis=-1, keepdims=True))
            agg = jnp.dot(p.astype(feat_ref.dtype),                   # bf16 @ bf16
                          feat_ref[:, h * C:(h + 1) * C],
                          preferred_element_type=jnp.float32)         # [TM, C]
            new_acc.append(alpha * acc_ref[:, h * C:(h + 1) * C] + agg)
            new_m.append(m_h)
        # single full-width scratch stores (no per-head masked vst)
        m_ref[...] = jnp.concatenate(new_m, axis=-1)
        l_ref[...] = jnp.concatenate(new_l, axis=-1)
        acc_ref[...] = jnp.concatenate(new_acc, axis=-1)

    @pl.when(k == num_col_tiles - 1)
    def _finalize():
        # Deferred softmax normalization; approx reciprocal uses the EUP slot.
        # max(.,1e-30) keeps all-padding rows finite (their results are discarded).
        inv = pl.reciprocal(jnp.maximum(l_ref[...], 1e-30), approx=True)  # [TM, H]
        pieces = [acc_ref[:, h * C:(h + 1) * C] * inv[:, h:h + 1]
                  for h in range(heads)]
        # TODO(synk): attention dropout (p=0.6) is identity in eval mode; not applied.
        out_ref[...] = (jnp.concatenate(pieces, axis=-1)
                        + bias_ref[...]).astype(out_ref.dtype)


# ---------------------------------------------------------------------------
# Wrappers
# ---------------------------------------------------------------------------

def _pick_config(n):
    """Generation-dependent tile sizes / VMEM limit; padded node count."""
    try:
        vmem_phys = int(pltpu.get_tpu_info().vmem_capacity_bytes)
    except Exception:
        vmem_phys = 64 * 1024 * 1024                  # conservative (v7x-like)
    if vmem_phys >= 96 * 1024 * 1024:                 # v5e / v6e (128 MiB VMEM)
        tm_t, tn_t, vmem_limit = 512, 1024, 96 * 1024 * 1024
    else:                                             # v7x (64 MiB VMEM)
        tm_t, tn_t, vmem_limit = 256, 512, 40 * 1024 * 1024
    n_pad = _round_up(n, 128)
    tn = min(tn_t, n_pad)                             # multiple of 128
    n_pad = _round_up(n, tn)
    tm = min(tm_t, tn)
    if tn % tm:
        tm = 128                                      # keep tm | tn | n_pad
    if n_pad // tm < 2:                               # >=2 row steps for dual-TC
        tm = max(8, n_pad // 2)
    return tm, tn, n_pad, vmem_limit


def gat_conv(x_pad, adj_pad, blk_nnz, w, att_src, att_dst, bias, *, heads,
             out_per_head, tm, tn, apply_input_elu, vmem_limit):
    """One GATConv layer (concat over heads; heads=1 equals concat=False)."""
    n_pad, f_in = x_pad.shape
    C = out_per_head
    hc = heads * C
    num_row_tiles = n_pad // tm
    num_col_tiles = n_pad // tn

    # A[h*C:(h+1)*C, h] = att_src[h], A[h*C:(h+1)*C, H+h] = att_dst[h]; fold into W.
    eye = jnp.eye(heads, dtype=jnp.float32)
    a_src = jnp.einsum('hc,hg->hcg', att_src, eye).reshape(hc, heads)
    a_dst = jnp.einsum('hc,hg->hcg', att_dst, eye).reshape(hc, heads)
    a_mat = jnp.concatenate([a_src, a_dst], axis=1)               # [H*C, 2H]
    w_aug = jnp.concatenate([w, w @ a_mat], axis=1).astype(jnp.bfloat16)

    feat, e = pl.pallas_call(
        functools.partial(gat_transform_kernel, hc=hc,
                          apply_input_elu=apply_input_elu),
        grid=(num_row_tiles,),
        in_specs=[
            pl.BlockSpec((tm, f_in), lambda i: (i, 0)),           # x row tile
            pl.BlockSpec((f_in, hc + 2 * heads), lambda i: (0, 0),
                         pipeline_mode=pl.Buffered(1)),           # resident weights
        ],
        out_specs=[
            pl.BlockSpec((tm, hc), lambda i: (i, 0)),             # feat (bf16)
            pl.BlockSpec((tm, 2 * heads), lambda i: (i, 0)),      # E    (f32)
        ],
        out_shape=[
            jax.ShapeDtypeStruct((n_pad, hc), jnp.bfloat16),
            jax.ShapeDtypeStruct((n_pad, 2 * heads), jnp.float32),
        ],
        compiler_params=pltpu.CompilerParams(
            dimension_semantics=("parallel",),
            vmem_limit_bytes=vmem_limit),
    )(x_pad, w_aug)

    # Tiny layout plumbing outside the kernel (feat stays [N, H*C]).
    e_src_t = e[:, :heads].T                                      # [H, N]
    e_dst = e[:, heads:]                                          # [N, H]

    out = pl.pallas_call(
        functools.partial(gat_attn_kernel, heads=heads, out_per_head=C,
                          num_col_tiles=num_col_tiles),
        grid_spec=pltpu.PrefetchScalarGridSpec(
            num_scalar_prefetch=1,                                # block-nnz table
            grid=(num_row_tiles, num_col_tiles),
            in_specs=[
                pl.BlockSpec((heads, tn), lambda i, k, nnz: (0, k)),   # e_src^T
                pl.BlockSpec((tm, heads), lambda i, k, nnz: (i, 0)),   # e_dst
                pl.BlockSpec((1, hc), lambda i, k, nnz: (0, 0),
                             pipeline_mode=pl.Buffered(1)),            # bias
                pl.BlockSpec((tm, tn), lambda i, k, nnz: (i, k)),      # int8 adj
                pl.BlockSpec((tn, hc), lambda i, k, nnz: (k, 0)),      # bf16 feat
            ],
            out_specs=pl.BlockSpec((tm, hc), lambda i, k, nnz: (i, 0)),
            scratch_shapes=[
                pltpu.VMEM((tm, heads), jnp.float32),   # running max
                pltpu.VMEM((tm, heads), jnp.float32),   # running rowsum
                pltpu.VMEM((tm, hc), jnp.float32),      # running aggregate
            ]),
        out_shape=jax.ShapeDtypeStruct((n_pad, hc), jnp.float32),
        compiler_params=pltpu.CompilerParams(
            dimension_semantics=("parallel", "arbitrary"),
            vmem_limit_bytes=vmem_limit),
    )(blk_nnz, e_src_t, e_dst, bias, adj_pad, feat)
    return out


def edge_index_to_adj(edge_index, num_nodes):
    src, dst = edge_index[0], edge_index[1]
    adj = jnp.zeros((num_nodes, num_nodes), jnp.int8)
    adj = adj.at[dst, src].set(1)                      # edge j -> i at adj[i, j]
    diag = jnp.arange(num_nodes)
    adj = adj.at[diag, diag].set(1)                    # add self loops (mandatory)
    return adj


def init_gat_params(key, in_channels, hidden_channels, out_channels, heads):
    def glorot(k, shape):
        fan_in, fan_out = shape[-2], shape[-1]
        lim = jnp.sqrt(6.0 / (fan_in + fan_out))
        return jax.random.uniform(k, shape, jnp.float32, -lim, lim)

    ks = jax.random.split(key, 6)
    return {
        "w1": glorot(ks[0], (in_channels, heads * hidden_channels)),
        "att_src1": glorot(ks[1], (heads, hidden_channels)),
        "att_dst1": glorot(ks[2], (heads, hidden_channels)),
        "b1": jnp.zeros((1, heads * hidden_channels), jnp.float32),
        "w2": glorot(ks[3], (heads * hidden_channels, out_channels)),
        "att_src2": glorot(ks[4], (1, out_channels)),
        "att_dst2": glorot(ks[5], (1, out_channels)),
        "b2": jnp.zeros((1, out_channels), jnp.float32),
    }


def gat_forward(x, edge_index, params, *, hidden_channels, out_channels, heads):
    n = x.shape[0]
    tm, tn, n_pad, vmem_limit = _pick_config(n)

    adj = edge_index_to_adj(edge_index, n)
    adj_p = jnp.pad(adj, ((0, n_pad - n), (0, n_pad - n)))        # zero padding
    x_p = jnp.pad(x, ((0, n_pad - n), (0, 0)))

    # per-(row-tile, col-tile) nonzero table for the block-sparse skip (SMEM prefetch)
    nmt, nkt = n_pad // tm, n_pad // tn
    blk = adj_p.reshape(nmt, tm, nkt, tn).astype(jnp.int32).sum(axis=(1, 3))
    blk_nnz = (blk > 0).astype(jnp.int32).reshape(-1)

    h = gat_conv(x_p, adj_p, blk_nnz, params["w1"], params["att_src1"],
                 params["att_dst1"], params["b1"], heads=heads,
                 out_per_head=hidden_channels, tm=tm, tn=tn,
                 apply_input_elu=False, vmem_limit=vmem_limit)
    out = gat_conv(h, adj_p, blk_nnz, params["w2"], params["att_src2"],
                   params["att_dst2"], params["b2"], heads=1,
                   out_per_head=out_channels, tm=tm, tn=tn,
                   apply_input_elu=True, vmem_limit=vmem_limit)    # ELU fused in
    return out[:n]


def _gatconv_ref(x, adj, w, att_src, att_dst, bias, heads, C, apply_elu):
    """Pure-JAX reference using the same bf16-at-MXU-boundary casts as the kernels."""
    if apply_elu:
        x = jnp.where(x > 0, x, jnp.exp(x) - 1.0)
    xb = x.astype(jnp.bfloat16)
    feat = jnp.dot(xb, w.astype(jnp.bfloat16),
                   preferred_element_type=jnp.float32).astype(jnp.bfloat16)
    outs = []
    for h in range(heads):
        wa_s = (w[:, h * C:(h + 1) * C] @ att_src[h]).astype(jnp.bfloat16)
        wa_d = (w[:, h * C:(h + 1) * C] @ att_dst[h]).astype(jnp.bfloat16)
        e_src = jnp.dot(xb, wa_s, preferred_element_type=jnp.float32)
        e_dst = jnp.dot(xb, wa_d, preferred_element_type=jnp.float32)
        s = e_dst[:, None] + e_src[None, :]
        s = jnp.where(s > 0, s, 0.2 * s)
        s = jnp.where(adj > 0, s, _MASK_VAL)
        p = jnp.exp(s - s.max(-1, keepdims=True))
        a = (p / p.sum(-1, keepdims=True)).astype(jnp.bfloat16)
        outs.append(jnp.dot(a, feat[:, h * C:(h + 1) * C],
                            preferred_element_type=jnp.float32))
    return jnp.concatenate(outs, axis=-1) + bias


if __name__ == "__main__":
    N, F_IN, HIDDEN, OUT, HEADS = 16, 8, 8, 4, 4

    key = jax.random.PRNGKey(0)
    kx, kp = jax.random.split(key)
    x = jax.random.normal(kx, (N, F_IN), jnp.float32)

    # small deterministic graph: bidirectional ring + a few chords
    idx = jnp.arange(N)
    src = jnp.concatenate([idx, (idx + 1) % N, idx, (idx + 5) % N])
    dst = jnp.concatenate([(idx + 1) % N, idx, (idx + 5) % N, idx])
    edge_index = jnp.stack([src, dst]).astype(jnp.int32)   # [2, 4N]

    params = init_gat_params(kp, F_IN, HIDDEN, OUT, HEADS)

    out = gat_forward(x, edge_index, params,
                      hidden_channels=HIDDEN, out_channels=OUT, heads=HEADS)
    out = jax.block_until_ready(out)
    assert out.shape == (N, OUT), out.shape

    # correctness check against a precision-matched pure-JAX reference
    adj = edge_index_to_adj(edge_index, N)
    h_ref = _gatconv_ref(x, adj, params["w1"], params["att_src1"],
                         params["att_dst1"], params["b1"], HEADS, HIDDEN, False)
    ref = _gatconv_ref(h_ref, adj, params["w2"], params["att_src2"],
                       params["att_dst2"], params["b2"], 1, OUT, True)
    err = float(jnp.max(jnp.abs(out - ref)))
    assert err < 3e-2, err   # bf16 MXU inputs + approx reciprocal -> relaxed tol

    print("KERNEL_OK")
</pallas_src>

<mosaic_0001>
module attributes {stable_mosaic.version = 11 : i64} {
  func.func @gat_transform_kernel(%arg0: i32, %arg1: memref<64x8xf32, #tpu.memory_space<vmem>>, %arg2: memref<8x40xbf16, #tpu.memory_space<vmem>>, %arg3: memref<64x32xbf16, #tpu.memory_space<vmem>>, %arg4: memref<64x8xf32, #tpu.memory_space<vmem>>) attributes {dimension_semantics = [#tpu.dimension_semantics<parallel>], iteration_bounds = array<i64: 2>, scalar_prefetch = 0 : i64, scratch_operands = 0 : i64, tpu.core_type = #tpu.core_type<tc>, window_params = [{transform_indices = @transform_0, window_bounds = array<i64: 64, 8>}, {pipeline_mode = #tpu.pipeline_mode<synchronous>, transform_indices = @transform_1, window_bounds = array<i64: 8, 40>}, {transform_indices = @transform_2, window_bounds = array<i64: 64, 32>}, {transform_indices = @transform_3, window_bounds = array<i64: 64, 8>}]} {
    %c0 = arith.constant 0 : index
    %c0_0 = arith.constant 0 : index
    %0 = vector.load %arg1[%c0, %c0_0] : memref<64x8xf32, #tpu.memory_space<vmem>>, vector<64x8xf32>
    %1 = arith.truncf %0 : vector<64x8xf32> to vector<64x8xbf16>
    %c0_1 = arith.constant 0 : index
    %c0_2 = arith.constant 0 : index
    %2 = vector.load %arg2[%c0_1, %c0_2] : memref<8x40xbf16, #tpu.memory_space<vmem>>, vector<8x40xbf16>
    %cst = arith.constant dense<0.000000e+00> : vector<64x40xf32>
    %3 = tpu.matmul %1, %2, %cst {dimension_numbers = #tpu.dot_dimension_numbers<[1], [0], [0], [1], [0, 0, 1, 1], [], []>} : vector<64x8xbf16>, vector<8x40xbf16>, vector<64x40xf32> -> vector<64x40xf32>
    %4 = vector.extract_strided_slice %3 {offsets = [0, 0], sizes = [64, 32], strides = [1, 1]} : vector<64x40xf32> to vector<64x32xf32>
    %5 = arith.truncf %4 : vector<64x32xf32> to vector<64x32xbf16>
    %c0_3 = arith.constant 0 : index
    %c0_4 = arith.constant 0 : index
    %6 = vector.load %arg3[%c0_3, %c0_4] : memref<64x32xbf16, #tpu.memory_space<vmem>>, vector<64x32xbf16>
    tpu.vector_store %arg3[%c0_3, %c0_4], %5 {strides = array<i32>} : memref<64x32xbf16, #tpu.memory_space<vmem>>, vector<64x32xbf16>,
    %7 = vector.extract_strided_slice %3 {offsets = [0, 32], sizes = [64, 8], strides = [1, 1]} : vector<64x40xf32> to vector<64x8xf32>
    %c0_5 = arith.constant 0 : index
    %c0_6 = arith.constant 0 : index
    %8 = vector.load %arg4[%c0_5, %c0_6] : memref<64x8xf32, #tpu.memory_space<vmem>>, vector<64x8xf32>
    tpu.vector_store %arg4[%c0_5, %c0_6], %7 {strides = array<i32>} : memref<64x8xf32, #tpu.memory_space<vmem>>, vector<64x8xf32>,
    return
  }
  func.func @transform_0(%arg0: i32) -> (i32, i32) {
    %c0_i32 = arith.constant 0 : i32
    %c0_i32_0 = arith.constant 0 : i32
    return %arg0, %c0_i32 : i32, i32
  }
  func.func @transform_1(%arg0: i32) -> (i32, i32) {
    %c0_i32 = arith.constant 0 : i32
    %c0_i32_0 = arith.constant 0 : i32
    %c0_i32_1 = arith.constant 0 : i32
    return %c0_i32, %c0_i32_0 : i32, i32
  }
  func.func @transform_2(%arg0: i32) -> (i32, i32) {
    %c0_i32 = arith.constant 0 : i32
    %c0_i32_0 = arith.constant 0 : i32
    return %arg0, %c0_i32 : i32, i32
  }
  func.func @transform_3(%arg0: i32) -> (i32, i32) {
    %c0_i32 = arith.constant 0 : i32
    %c0_i32_0 = arith.constant 0 : i32
    return %arg0, %c0_i32 : i32, i32
  }
}

</mosaic_0001>

<bundles_post_ra>
// kernel: tpu_custom_call.1
= control target key start
LH: loop header
LB: loop body
LE: loop exit
PB: predicated region body
PF: predicated region fallthrough
CT: control target
= control target key end

     0   :  { %s453_s12 = smov 0   ;;  %s514_s0 = inlined_call_operand.vmem [shape: f32[128,8], index: 0, kind: input, shape index: {}]   ;;  %s515_s1 = inlined_call_operand.vmem [shape: bf16[8,40], index: 1, kind: input, shape index: {}]   ;;  %s516_s2 = inlined_call_operand.vmem [shape: bf16[128,32], index: 2, kind: output, shape index: {0}]   ;;  %s517_s3 = inlined_call_operand.vmem [shape: f32[128,8], index: 3, kind: output, shape index: {1}]  }
   0x1 LB: > { %s395_s13 = sadd.s32 4294967295, %s430_s12   ;;  %p399_p0 = scmp.ge.s32.totalorder %s430_s12, 1  ;;  %s430_s12 = sphi %s453_s12, %s14_s12  }
   0x2   : > { %p141_p1 = scmp.lt.s32.totalorder %s430_s12, 3 }
   0x4   : > { %p142_p2 = pnand %p399_p0, %p141_p1 }
   0x5   : > { %s400_s16 = sshll.u32 (!%p142_p2), %s395_s13, 3  ;;  %s432_s25 = smov (!%p142_p2), 96  }
   0x6   : > { %145 = sbr.rel (%p142_p2) target bundleno = 276 (0x114), region = 28  ;;  %p171_p3 = scmp.lt.s32.totalorder (!%p142_p2), %s400_s16, 15 }
   0xb   : > { %v201_v0 = vld [vmem:[%s515_s1] sm:$0xf]  ;;  %vm215_vm0 = vcmask 1043456   ;;  %s519_s16 = smov (!%p171_p3, %s400_s16), 15  ;;  %vm202_vm1 = vcmask 64512   ;;  %vm256_vm2 = vcmask 257024  }
   0xc   : > { %v217_v1 = vsel %vm215_vm0, %v201_v0, 0  ;;  %s401_s17 = sshll.u32 %s519_s16, 3  ;;  %s403_s21 = sshll.u32 %s519_s16, 2 }
   0xd   : > { %226 = vmatpush.bf16.msra.mxu0 %v217_v1  ;;  %412 = vmatpush.bf16.msra.mxu1 %v217_v1  ;;  %s174_s20 = scalar_lea.vmem %s514_s0, %s401_s17  ;;  %s480_s24 = scalar_lea.vmem %s516_s2, %s403_s21 }
   0xe   : > { %414 = vmatpush.bf16.msra.mxu3 %v217_v1  ;;  %413 = vmatpush.bf16.msra.mxu2 %v217_v1  ;;  %v189_v2 = vld [vmem:[%s174_s20] sm:$0xff]  ;;  %v190_v3 = vld [vmem:[%s174_s20 + $0x8] sm:$0xff]  ;;  %v191_v4 = vld [vmem:[%s174_s20 + $0x10] sm:$0xff]  ;;  %s186_s28 = scalar_lea.vmem %s517_s3, %s401_s17 }
   0xf   : > { %v197_v5 = vpack.c.bf16 %v190_v3, %v189_v2  ;;  %v192_v6 = vld [vmem:[%s174_s20 + $0x18] sm:$0xff]  ;;  %v195_v7 = vld [vmem:[%s174_s20 + $0x30] sm:$0xff]  ;;  %v193_v11 = vld [vmem:[%s174_s20 + $0x20] sm:$0xff] }
  0x10   : > { %v196_v8 = vld [vmem:[%s174_s20 + $0x38] sm:$0xff]  ;;  %v198_v9 = vpack.c.bf16 %v192_v6, %v191_v4  ;;  %v194_v12 = vld [vmem:[%s174_s20 + $0x28] sm:$0xff] }
  0x11   : > { %v200_v10 = vpack.c.bf16 %v196_v8, %v195_v7  ;;  %406 = vmatmul.msk.bf16.vlgmr.msra.gmra.mxu0 %vm202_vm1, %v197_v5  ;;  %v199_v13 = vpack.c.bf16 %v194_v12, %v193_v11 }
  0x12   : > { %407 = vmatmul.msk.bf16.vlgmr.msra.gmra.mxu1 %vm202_vm1, %v198_v9 }
  0x13   : > { %409 = vmatmul.msk.bf16.vlgmr.msra.gmra.mxu3 %vm202_vm1, %v200_v10  ;;  %408 = vmatmul.msk.bf16.vlgmr.msra.gmra.mxu2 %vm202_vm1, %v199_v13 }
  0x8e   : > { %v228_v14 = vpop.f32.mrf.mxu0 }
  0x8f   : > { %v248_v15 = vpack.c.bf16 %v228_v14, %v228_v14  ;;  %v233_v16 = vpop.f32.mrf.mxu1  ;;  %273 = vrot.lane.b32.xlu0 %v228_v14, %s432_s25 }
  0x90   : > { %v250_v17 = vpack.c.bf16 %v233_v16, %v233_v16  ;;  %277 = vrot.lane.b32.xlu1 %v233_v16, %s432_s25 }
  0x91   : > { %257 = vst.msk [vmem:[%s480_s24] sm:$0xf] %vm256_vm2, %v248_v15 }
  0x92   : > { %259 = vst.msk [vmem:[%s480_s24 + $0x8] sm:$0xf] %vm256_vm2, %v250_v17 }
  0x96   : > { %v243_v18 = vpop.f32.mrf.mxu3  ;;  %v230_v20 = vpop.f32.mrf.mxu0 }
  0x97   : > { %v254_v19 = vpack.c.bf16 %v243_v18, %v243_v18  ;;  %v238_v21 = vpop.f32.mrf.mxu2  ;;  %v249_v22 = vpack.c.bf16 %v230_v20, %v230_v20  ;;  %v235_v23 = vpop.f32.mrf.mxu1  ;;  %275 = vrot.lane.b32.xlu0 %v230_v20, %s432_s25 }
  0x98   : > { %v252_v24 = vpack.c.bf16 %v238_v21, %v238_v21  ;;  %281 = vrot.lane.b32.xlu2 %v238_v21, %s432_s25  ;;  %v251_v25 = vpack.c.bf16 %v235_v23, %v235_v23  ;;  %279 = vrot.lane.b32.xlu1 %v235_v23, %s432_s25 }
  0x99   : > { %263 = vst.msk [vmem:[%s480_s24 + $0x18] sm:$0xf] %vm256_vm2, %v254_v19 }
  0x9a   : > { %258 = vst.msk [vmem:[%s480_s24 + $0x4] sm:$0xf] %vm256_vm2, %v249_v22 }
  0x9b   : > { %260 = vst.msk [vmem:[%s480_s24 + $0xc] sm:$0xf] %vm256_vm2, %v251_v25 }
  0x9c   : > { %261 = vst.msk [vmem:[%s480_s24 + $0x10] sm:$0xf] %vm256_vm2, %v252_v24 }
  0x9e   : > { %v245_v26 = vpop.f32.mrf.mxu3 }
  0x9f   : > { %v255_v27 = vpack.c.bf16 %v245_v26, %v245_v26  ;;  %v240_v28 = vpop.f32.mrf.mxu2  ;;  %285 = vrot.lane.b32.xlu0 %v243_v18, %s432_s25 }
  0xa0   : > { %v253_v29 = vpack.c.bf16 %v240_v28, %v240_v28  ;;  %283 = vrot.lane.b32.xlu2 %v240_v28, %s432_s25  ;;  %287 = vrot.lane.b32.xlu1 %v245_v26, %s432_s25 }
  0xa1   : > { %264 = vst.msk [vmem:[%s480_s24 + $0x1c] sm:$0xf] %vm256_vm2, %v255_v27 }
  0xa2   : > { %262 = vst.msk [vmem:[%s480_s24 + $0x14] sm:$0xf] %vm256_vm2, %v253_v29 }
  0xf2   : > { %v282_v30 = vpop.permute.xlu2 %281 }
  0xf3   : > { %301 = vst.msk [vmem:[%s186_s28 + $0x20] sm:$0xff] %vm202_vm1, %v282_v30 }
  0xfa   : > { %v284_v31 = vpop.permute.xlu2 %283 }
  0xfb   : > { %302 = vst.msk [vmem:[%s186_s28 + $0x28] sm:$0xff] %vm202_vm1, %v284_v31 }
 0x101   : > { %v274_v32 = vpop.permute.xlu0 %273 }
 0x102   : > { %v278_v33 = vpop.permute.xlu1 %277  ;;  %297 = vst.msk [vmem:[%s186_s28] sm:$0xff] %vm202_vm1, %v274_v32 }
 0x103   : > { %299 = vst.msk [vmem:[%s186_s28 + $0x10] sm:$0xff] %vm202_vm1, %v278_v33 }
 0x109   : > { %v276_v34 = vpop.permute.xlu0 %275 }
 0x10a   : > { %v280_v35 = vpop.permute.xlu1 %279  ;;  %298 = vst.msk [vmem:[%s186_s28 + $0x8] sm:$0xff] %vm202_vm1, %v276_v34 }
 0x10b   : > { %300 = vst.msk [vmem:[%s186_s28 + $0x18] sm:$0xff] %vm202_vm1, %v280_v35 }
 0x111   : > { %v286_v36 = vpop.permute.xlu0 %285 }
 0x112   : > { %v288_v37 = vpop.permute.xlu1 %287  ;;  %303 = vst.msk [vmem:[%s186_s28 + $0x30] sm:$0xff] %vm202_vm1, %v286_v36 }
 0x113   : > { %304 = vst.msk [vmem:[%s186_s28 + $0x38] sm:$0xff] %vm202_vm1, %v288_v37 }
 0x114 PF: > { %s14_s12 = sadd.s32 1, %s430_s12  }
 0x115   : > { %p11_p4 = scmp.ge.s32.totalorder %s14_s12, 4  }
 0x117   :  { %13 = sbr.rel (!%p11_p4) target bundleno = 1 (0x1), region = 70 }

</bundles_post_ra>
